<compile_context>
chip_gen: v6e
topology: v6e:2x2x1
jax: 0.10.0
libtpu: 0.0.40
codegen_flags: <defaults>
</compile_context>

<pallas_src>
import jax
import jax.numpy as jnp
import numpy as np
from jax.experimental import pallas as pl
from jax.experimental.pallas import tpu as pltpu


def _aaf_kernel(hb_ref, x_ref, wenc_ref, benc_ref, wpi_ref, bpi_ref, o_ref):
    # hb_ref : SMEM (B,) int32 (scalar prefetch) -- per-batch hand bit
    # x_ref  : VMEM (C_in, TN)  -- one batch row, one HW tile
    # o_ref  : VMEM (1, TN)
    b = pl.program_id(0)
    hb = hb_ref[b]                                            # scalar in {0,1}

    x = x_ref[...]                                            # (C_in, TN)

    # synthetic encoder (1x1 conv) followed by the module's ReLU
    z = jnp.dot(wenc_ref[...], x, preferred_element_type=jnp.float32)
    z = jnp.maximum(z + benc_ref[...], 0.0)                   # (C_hid, TN)

    # conv_pi fused with qs[b, hand_bits[b]]:
    #   dot(w_pi[hb], z_b) + b_pi[hb]
    # NOTE: matches torch indexing only for hand_bits in {0, 1}.
    w_sel = jnp.where(hb == 0, wpi_ref[0:1, :], wpi_ref[1:2, :])   # (1, C_hid)
    b_sel = jnp.where(hb == 0, bpi_ref[0:1, :], bpi_ref[1:2, :])   # (1, 1)
    sel = jnp.dot(w_sel, z, preferred_element_type=jnp.float32) + b_sel
    o_ref[...] = sel.astype(o_ref.dtype)


@jax.jit
def aaf_forward(x_nchw, hand_bits, w_enc, b_enc, w_pi, b_pi):
    """x_nchw: (B, C_in, H, W) float32; hand_bits: (B,) int32 in {0, 1}."""
    B, C_in, H, W = x_nchw.shape
    HW = H * W
    C_hid = w_enc.shape[0]      # 32
    C_out = w_pi.shape[0]       # 2

    # Native layout, no HBM transpose: (B, C_in, HW) is a free reshape of NCHW.
    x3 = x_nchw.reshape(B, C_in, HW)

    # Lane tiling over HW: one fat tile when it fits, else 8192-wide tiles.
    max_tile = 8192
    if HW <= max_tile:
        tn = max(128, ((HW + 127) // 128) * 128)
        hw_pad = tn
    else:
        tn = max_tile
        hw_pad = ((HW + tn - 1) // tn) * tn
    if hw_pad != HW:
        x3 = jnp.pad(x3, ((0, 0), (0, 0), (0, hw_pad - HW)))
    num_tiles = hw_pad // tn

    benc = b_enc.reshape(C_hid, 1)
    bpi = b_pi.reshape(C_out, 1)
    hb = hand_bits.astype(jnp.int32)

    cost = pl.CostEstimate(
        flops=2 * B * HW * (C_in * C_hid + C_hid),
        transcendentals=0,
        bytes_accessed=4 * (B * HW * (C_in + 1)
                            + C_hid * C_in + C_hid + C_out * C_hid + C_out),
    )

    out = pl.pallas_call(
        _aaf_kernel,
        out_shape=jax.ShapeDtypeStruct((B, 1, hw_pad), jnp.float32),
        grid_spec=pltpu.PrefetchScalarGridSpec(
            num_scalar_prefetch=1,
            grid=(B, num_tiles),
            in_specs=[
                pl.BlockSpec((pl.Squeezed(), C_in, tn),
                             lambda b, p, _hb: (b, 0, p)),
                pl.BlockSpec((C_hid, C_in), lambda b, p, _hb: (0, 0)),
                pl.BlockSpec((C_hid, 1), lambda b, p, _hb: (0, 0)),
                pl.BlockSpec((C_out, C_hid), lambda b, p, _hb: (0, 0)),
                pl.BlockSpec((C_out, 1), lambda b, p, _hb: (0, 0)),
            ],
            out_specs=pl.BlockSpec((pl.Squeezed(), 1, tn),
                                   lambda b, p, _hb: (b, 0, p)),
        ),
        compiler_params=pltpu.CompilerParams(
            dimension_semantics=("parallel", "parallel"),
            vmem_limit_bytes=32 * 1024 * 1024),
        cost_estimate=cost,
    )(hb, x3, w_enc, benc, w_pi, bpi)

    # Drop padded lanes (no-op when HW is already lane-aligned) -> (B, HW).
    return out[:, 0, :HW]


def _reference(x_nchw, hand_bits, w_enc, b_enc, w_pi, b_pi):
    B, C_in, H, W = x_nchw.shape
    x = x_nchw.reshape(B, C_in, H * W)
    z = jnp.maximum(
        jnp.einsum("oc,bcp->bop", w_enc, x) + b_enc[None, :, None], 0.0)
    q = jnp.einsum("oc,bcp->bop", w_pi, z) + b_pi[None, :, None]    # (B,2,HW)
    sel = q[jnp.arange(B), hand_bits]                               # (B, HW)
    return sel


if __name__ == "__main__":
    key = jax.random.PRNGKey(0)
    k_x, k_hb, k_we, k_wp = jax.random.split(key, 4)

    B, C_in, H, W = 2, 4, 16, 16
    C_hid, C_out = 32, 2

    x = jax.random.normal(k_x, (B, C_in, H, W), dtype=jnp.float32)
    hand_bits = jax.random.randint(k_hb, (B,), 0, 2, dtype=jnp.int32)

    # synthetic encoder params (deterministic)
    w_enc = jax.random.normal(k_we, (C_hid, C_in), dtype=jnp.float32) * np.sqrt(
        2.0 / C_in)
    b_enc = jnp.zeros((C_hid,), dtype=jnp.float32)

    # conv_pi: kaiming_normal_(mode='fan_in', nonlinearity='relu'), bias=0
    w_pi = jax.random.normal(k_wp, (C_out, C_hid), dtype=jnp.float32) * np.sqrt(
        2.0 / C_hid)
    b_pi = jnp.zeros((C_out,), dtype=jnp.float32)

    out = aaf_forward(x, hand_bits, w_enc, b_enc, w_pi, b_pi)
    out = jax.block_until_ready(out)

    ref = _reference(x, hand_bits, w_enc, b_enc, w_pi, b_pi)
    assert out.shape == (B, H * W), out.shape
    np.testing.assert_allclose(np.asarray(out), np.asarray(ref),
                               rtol=1e-5, atol=1e-5)

    print("KERNEL_OK")
</pallas_src>

<mosaic_0001>
module attributes {stable_mosaic.version = 11 : i64} {
  func.func @_aaf_kernel(%arg0: i32, %arg1: i32, %arg2: memref<2xi32, #tpu.memory_space<smem>>, %arg3: memref<1x4x256xf32, #tpu.memory_space<vmem>>, %arg4: memref<32x4xf32, #tpu.memory_space<vmem>>, %arg5: memref<32x1xf32, #tpu.memory_space<vmem>>, %arg6: memref<2x32xf32, #tpu.memory_space<vmem>>, %arg7: memref<2x1xf32, #tpu.memory_space<vmem>>, %arg8: memref<1x1x256xf32, #tpu.memory_space<vmem>>) attributes {dimension_semantics = [#tpu.dimension_semantics<parallel>, #tpu.dimension_semantics<parallel>], iteration_bounds = array<i64: 2, 1>, scalar_prefetch = 1 : i64, scratch_operands = 0 : i64, tpu.core_type = #tpu.core_type<tc>, window_params = [{transform_indices = @transform_0, window_bounds = array<i64: 1, 4, 256>}, {pipeline_mode = #tpu.pipeline_mode<synchronous>, transform_indices = @transform_1, window_bounds = array<i64: 32, 4>}, {pipeline_mode = #tpu.pipeline_mode<synchronous>, transform_indices = @transform_2, window_bounds = array<i64: 32, 1>}, {pipeline_mode = #tpu.pipeline_mode<synchronous>, transform_indices = @transform_3, window_bounds = array<i64: 2, 32>}, {pipeline_mode = #tpu.pipeline_mode<synchronous>, transform_indices = @transform_4, window_bounds = array<i64: 2, 1>}, {transform_indices = @transform_5, window_bounds = array<i64: 1, 1, 256>}]} {
    %0 = arith.index_cast %arg0 : i32 to index
    %1 = memref.load %arg2[%0] : memref<2xi32, #tpu.memory_space<smem>>
    %c0 = arith.constant 0 : index
    %c0_0 = arith.constant 0 : index
    %c0_1 = arith.constant 0 : index
    %2 = vector.load %arg3[%c0, %c0_0, %c0_1] : memref<1x4x256xf32, #tpu.memory_space<vmem>>, vector<1x4x256xf32>
    %3 = vector.shape_cast %2 : vector<1x4x256xf32> to vector<4x256xf32>
    %c0_2 = arith.constant 0 : index
    %c0_3 = arith.constant 0 : index
    %4 = vector.load %arg4[%c0_2, %c0_3] : memref<32x4xf32, #tpu.memory_space<vmem>>, vector<32x4xf32>
    %cst = arith.constant dense<0.000000e+00> : vector<32x256xf32>
    %5 = tpu.matmul %4, %3, %cst {dimension_numbers = #tpu.dot_dimension_numbers<[1], [0], [0], [1], [0, 0, 1, 1], [], []>} : vector<32x4xf32>, vector<4x256xf32>, vector<32x256xf32> -> vector<32x256xf32>
    %c0_4 = arith.constant 0 : index
    %c0_5 = arith.constant 0 : index
    %6 = vector.load %arg5[%c0_4, %c0_5] : memref<32x1xf32, #tpu.memory_space<vmem>>, vector<32x1xf32>
    %7 = vector.broadcast %6 : vector<32x1xf32> to vector<32x256xf32>
    %8 = arith.addf %5, %7 : vector<32x256xf32>
    %cst_6 = arith.constant 0.000000e+00 : f32
    %9 = vector.broadcast %cst_6 : f32 to vector<32x256xf32>
    %10 = arith.maximumf %8, %9 : vector<32x256xf32>
    %c0_i32 = arith.constant 0 : i32
    %11 = arith.cmpi eq, %1, %c0_i32 : i32
    %c0_7 = arith.constant 0 : index
    %c0_8 = arith.constant 0 : index
    %12 = vector.load %arg6[%c0_7, %c0_8] : memref<2x32xf32, #tpu.memory_space<vmem>>, vector<1x32xf32>
    %c1 = arith.constant 1 : index
    %c0_9 = arith.constant 0 : index
    %13 = vector.load %arg6[%c1, %c0_9] : memref<2x32xf32, #tpu.memory_space<vmem>>, vector<1x32xf32>
    %14 = arith.select %11, %12, %13 : vector<1x32xf32>
    %c0_i32_10 = arith.constant 0 : i32
    %15 = arith.cmpi eq, %1, %c0_i32_10 : i32
    %c0_11 = arith.constant 0 : index
    %c0_12 = arith.constant 0 : index
    %16 = vector.load %arg7[%c0_11, %c0_12] : memref<2x1xf32, #tpu.memory_space<vmem>>, vector<1x1xf32>
    %c1_13 = arith.constant 1 : index
    %c0_14 = arith.constant 0 : index
    %17 = vector.load %arg7[%c1_13, %c0_14] : memref<2x1xf32, #tpu.memory_space<vmem>>, vector<1x1xf32>
    %18 = arith.select %15, %16, %17 : vector<1x1xf32>
    %cst_15 = arith.constant dense<0.000000e+00> : vector<1x256xf32>
    %19 = tpu.matmul %14, %10, %cst_15 {dimension_numbers = #tpu.dot_dimension_numbers<[1], [0], [0], [1], [0, 0, 1, 1], [], []>} : vector<1x32xf32>, vector<32x256xf32>, vector<1x256xf32> -> vector<1x256xf32>
    %20 = vector.broadcast %18 : vector<1x1xf32> to vector<1x256xf32>
    %21 = arith.addf %19, %20 : vector<1x256xf32>
    %c0_16 = arith.constant 0 : index
    %c0_17 = arith.constant 0 : index
    %c0_18 = arith.constant 0 : index
    %22 = vector.load %arg8[%c0_16, %c0_17, %c0_18] : memref<1x1x256xf32, #tpu.memory_space<vmem>>, vector<1x1x256xf32>
    %23 = vector.shape_cast %22 : vector<1x1x256xf32> to vector<1x256xf32>
    %24 = vector.shape_cast %21 : vector<1x256xf32> to vector<1x1x256xf32>
    tpu.vector_store %arg8[%c0_16, %c0_17, %c0_18], %24 {strides = array<i32>} : memref<1x1x256xf32, #tpu.memory_space<vmem>>, vector<1x1x256xf32>,
    return
  }
  func.func @transform_0(%arg0: i32, %arg1: i32, %arg2: memref<2xi32, #tpu.memory_space<smem>>) -> (i32, i32, i32) {
    %c0_i32 = arith.constant 0 : i32
    %c0_i32_0 = arith.constant 0 : i32
    return %arg0, %c0_i32, %arg1 : i32, i32, i32
  }
  func.func @transform_1(%arg0: i32, %arg1: i32, %arg2: memref<2xi32, #tpu.memory_space<smem>>) -> (i32, i32) {
    %c0_i32 = arith.constant 0 : i32
    %c0_i32_0 = arith.constant 0 : i32
    %c0_i32_1 = arith.constant 0 : i32
    return %c0_i32, %c0_i32_0 : i32, i32
  }
  func.func @transform_2(%arg0: i32, %arg1: i32, %arg2: memref<2xi32, #tpu.memory_space<smem>>) -> (i32, i32) {
    %c0_i32 = arith.constant 0 : i32
    %c0_i32_0 = arith.constant 0 : i32
    %c0_i32_1 = arith.constant 0 : i32
    return %c0_i32, %c0_i32_0 : i32, i32
  }
  func.func @transform_3(%arg0: i32, %arg1: i32, %arg2: memref<2xi32, #tpu.memory_space<smem>>) -> (i32, i32) {
    %c0_i32 = arith.constant 0 : i32
    %c0_i32_0 = arith.constant 0 : i32
    %c0_i32_1 = arith.constant 0 : i32
    return %c0_i32, %c0_i32_0 : i32, i32
  }
  func.func @transform_4(%arg0: i32, %arg1: i32, %arg2: memref<2xi32, #tpu.memory_space<smem>>) -> (i32, i32) {
    %c0_i32 = arith.constant 0 : i32
    %c0_i32_0 = arith.constant 0 : i32
    %c0_i32_1 = arith.constant 0 : i32
    return %c0_i32, %c0_i32_0 : i32, i32
  }
  func.func @transform_5(%arg0: i32, %arg1: i32, %arg2: memref<2xi32, #tpu.memory_space<smem>>) -> (i32, i32, i32) {
    %c0_i32 = arith.constant 0 : i32
    %c0_i32_0 = arith.constant 0 : i32
    return %arg0, %c0_i32, %arg1 : i32, i32, i32
  }
}

</mosaic_0001>

<bundles_post_ra>
// kernel: aaf_forward.1
= control target key start
LH: loop header
LB: loop body
LE: loop exit
PB: predicated region body
PF: predicated region fallthrough
CT: control target
= control target key end

     0   :  { %s824_s0 = inlined_call_operand.vmem [shape: s32[2], index: 0, kind: input, shape index: {}]   ;;  %s825_s1 = inlined_call_operand.vmem [shape: f32[2,4,256], index: 1, kind: input, shape index: {}]   ;;  %s826_s2 = inlined_call_operand.vmem [shape: f32[32,4], index: 2, kind: input, shape index: {}]   ;;  %s827_s3 = inlined_call_operand.vmem [shape: f32[32,1], index: 3, kind: input, shape index: {}]   ;;  %s828_s4 = inlined_call_operand.vmem [shape: f32[2,32], index: 4, kind: input, shape index: {}]   ;;  %s829_s5 = inlined_call_operand.vmem [shape: f32[2,1], index: 5, kind: input, shape index: {}]   ;;  %s830_s6 = inlined_call_operand.vmem [shape: f32[2,1,256], index: 6, kind: output, shape index: {}]  }
   0x1   :  { %s11_s23 = sshll.u32 %s824_s0, 4  ;;  %s12_s23 = int_to_ptr.vmem [resolvable:$true] %s11_s23 }
   0x2   :  { %s659_s24 = scalar_lea.vmem %s12_s23, 16  ;;  %p664_p1 = scmp.lt.s32.totalorder %s12_s23, %s12_s23 }
   0x3   :  { %p660_p0 = scmp.ne.s32.totalorder %s12_s23, %s659_s24  ;;  %p665_p2 = scmp.lt.s32.totalorder %s659_s24, %s659_s24 }
   0x5   :  { %p666_p3 = por %p665_p2, %p664_p1 }
   0x7   :  { %p667_p4 = pnand %p666_p3, %p660_p0 }
   0x9   :  { %670 = shalt.err (!%p667_p4)  }
   0xa   :  { %s697_s25 = smov [#allocation3]  }
   0xb   :  { %14 = dma.vmem_to_smem %s12_s23, 16, %s697_s25, [#allocation2] }
   0xc   :  { %683 = dma.done.wait [#allocation2], 16 }
   0xd   :  { %684 = vsyncadd [#allocation2], 4294967280 }
   0xe   :  { %16 = sfence }
   0xf   :  { %s739_s26 = smov 0   ;;  %s741_s27 = smov 0  }
  0x10   :  { %s743_s28 = smov 0  }
  0x11 LB: > { %s34_s0 = sadd.s32 1, %s691_s27  ;;  %p614_p5 = scmp.ge.s32.totalorder %s695_s28, 1  ;;  %s695_s28 = sphi %s743_s28, %s22_s28   ;;  %s691_s27 = sphi %s741_s27, %s834_s27   ;;  %s687_s26 = sphi %s739_s26, %s833_s26  }
  0x12   : > { %p36_p6 = scmp.ge.s32.totalorder %s34_s0, 2  ;;  %p215_p7 = scmp.lt.s32.totalorder %s695_s28, 3 }
  0x14   : > { %s836_s0 = smov (%p36_p6, %s34_s0), 0  ;;  %p216_p8 = pnand %p614_p5, %p215_p7 }
  0x15   : > { %p251_p9 = scmp.lt.s32.totalorder (!%p216_p8), %s687_s26, 1  ;;  %s269_s7 = sld [smem:[#allocation3 + %s687_s26]] (!%p216_p8) }
  0x16   : > { %219 = sbr.rel (%p216_p8) target bundleno = 459 (0x1cb), region = 40 }
  0x1b   : > { %v698_v0 = vmov 0.0   ;;  %v276_v1 = vld [vmem:[%s827_s3 + $0x8] sm:$0xff]  ;;  %s838_s26 = smov (!%p251_p9, %s687_s26), 1  ;;  %v699_v2 = vmov 0   ;;  %v278_v3 = vld [vmem:[%s827_s3 + $0x18] sm:$0xff]  ;;  %v275_v4 = vld [vmem:[%s827_s3] sm:$0xff]  ;;  %v512_v50 = vlaneseq }
  0x1c   : > { %383 = vmatprep.mubr.f32.mxu0 %v698_v0  ;;  %499 = vmatprep.mubr.f32.mxu1 %v698_v0  ;;  %s627_s10 = sshll.u32 %s838_s26, 3  ;;  %v277_v5 = vld [vmem:[%s827_s3 + $0x10] sm:$0xff]  ;;  %vm314_vm0 = vcmask 1043456   ;;  %p416_p10 = scmp.eq.s32.totalorder %s269_s7, 0  ;;  %v271_v8 = vld [vmem:[%s826_s2] sm:$0xff]  ;;  %vm301_vm1 = vcmask 31744  }
  0x1d   : > { %657 = vset.pattern.permute.xlu1 %v699_v2  ;;  %656 = vset.pattern.permute.xlu0 %v699_v2  ;;  %s258_s17 = scalar_lea.vmem %s825_s1, %s627_s10  ;;  %v423_v9 = vld [vmem:[%s829_s5] sm:$0x1]  ;;  %v424_v10 = vld [vmem:[%s829_s5 + $0x1] sm:$0x1]  ;;  %v272_v12 = vld [vmem:[%s826_s2 + $0x8] sm:$0xff]  ;;  %vm431_vm3 = vcmask 261120  }
  0x1e   : > { %286 = vperm.xlu1 %657, %v276_v1   ;;  %296 = vperm.xlu0 %656, %v278_v3   ;;  %v270_v6 = vld [vmem:[%s258_s17] sm:$0xff]  ;;  %s419_s20 = scalar_select %p416_p10, 1, 0  ;;  %v273_v15 = vld [vmem:[%s826_s2 + $0x10] sm:$0xff]  ;;  %v274_v16 = vld [vmem:[%s826_s2 + $0x18] sm:$0xff]  ;;  %v513_v52 = vshrl.u32 %v512_v50, 7 }
  0x1f   : > { %v300_v7 = vcombine.high %v270_v6, %v270_v6  ;;  %v417_v42 = vld [vmem:[%s828_s4] sm:$0x1]  ;;  %v418_v43 = vld [vmem:[%s828_s4 + $0x1] sm:$0x1]  ;;  %v700_v48 = vmov 1966171168  }
  0x20   : > { %v420_v11 = vstv %s419_s20  ;;  %v510_v49 = vunpack.c.l.s4 %v700_v48  ;;  %s617_s14 = sshll.u32 %s838_s26, 1  ;;  %vm526_vm4 = vcmp.lt.s32.totalorder %v512_v50, 256 }
  0x21   : > { %618 = vmatprep.subr.msk.mxu0 %vm314_vm0, %v300_v7  ;;  %vm788_vm2 = vcmp.eq.s32.totalorder %v420_v11, 1  ;;  %s267_s17 = scalar_lea.vmem %s830_s6, %s617_s14 }
  0x22   : > { %281 = vperm.xlu1 %657, %v275_v4   ;;  %291 = vperm.xlu0 %656, %v277_v5   ;;  %v425_v14 = vsel %vm788_vm2, %v423_v9, %v424_v10  ;;  %v422_v47 = vsel %vm788_vm2, %v417_v42, %v418_v43  ;;  %v511_v51 = vunpack.c.0.s8 %v510_v49 }
  0x23   : > { %619 = vmatpush1.msk.msra.mxu0 %vm314_vm0, %v270_v6 }
  0x24   : > { %620 = vmatmul.mubr.msk.f32.vlgmr.msra.gmra.mxu0 %vm301_vm1, %v271_v8  ;;  %v514_v58 = vsub.s32 %v511_v51, %v513_v52 }
  0x25   : > { %389 = vmatprep.mubr.f32.mxu0 %v698_v0 }
  0x26   : > { %428 = vperm.xlu0 %656, %v425_v14  }
  0x28   : > { %621 = vmatmul.mubr.msk.f32.gmra.mxu0 %vm301_vm1, %v272_v12 }
  0x29   : > { %395 = vmatprep.mubr.f32.mxu0 %v698_v0 }
  0x2c   : > { %622 = vmatmul.mubr.msk.f32.gmra.mxu0 %vm301_vm1, %v273_v15 }
  0x2d   : > { %401 = vmatprep.mubr.f32.mxu0 %v698_v0 }
  0x30   : > { %623 = vmatmul.mubr.msk.f32.gmra.mxu0 %vm301_vm1, %v274_v16 }
  0x99   : > { %v297_v21 = vpop.permute.xlu0 %296  ;;  %v287_v24 = vpop.permute.xlu1 %286 }
  0x9d   : > { %v292_v26 = vpop.permute.xlu0 %291  ;;  %v282_v32 = vpop.permute.xlu1 %281 }
  0xa1   : > { %v429_v54 = vpop.permute.xlu0 %428 }
  0xe4   : > { %v385_v17 = vpop.f32.mrf.mxu0 }
  0xe5   : > { %v386_v39 = vadd.f32 %v385_v17, %v282_v32 }
  0xe6   : > { %v387_v18 = vpop.f32.mrf.mxu0 }
  0xe7   : > { %v388_v37 = vadd.f32 %v387_v18, %v282_v32  ;;  %v408_v46 = vmax.f32 %v386_v39, 0.0 }
  0xe8   : > { %v391_v19 = vpop.f32.mrf.mxu0 }
  0xe9   : > { %v392_v35 = vadd.f32 %v391_v19, %v287_v24  ;;  %v409_v45 = vmax.f32 %v388_v37, 0.0 }
  0xea   : > { %v393_v20 = vpop.f32.mrf.mxu0 }
  0xeb   : > { %v394_v33 = vadd.f32 %v393_v20, %v287_v24  ;;  %v410_v44 = vmax.f32 %v392_v35, 0.0 }
  0xec   : > { %v397_v22 = vpop.f32.mrf.mxu0 }
  0xed   : > { %v398_v31 = vadd.f32 %v397_v22, %v292_v26  ;;  %v411_v41 = vmax.f32 %v394_v33, 0.0 }
  0xee   : > { %v399_v23 = vpop.f32.mrf.mxu0 }
  0xef   : > { %v400_v29 = vadd.f32 %v399_v23, %v292_v26  ;;  %v412_v40 = vmax.f32 %v398_v31, 0.0 }
  0xf0   : > { %v403_v25 = vpop.f32.mrf.mxu0 }
  0xf1   : > { %v404_v27 = vadd.f32 %v403_v25, %v297_v21  ;;  %v413_v38 = vmax.f32 %v400_v29, 0.0 }
  0xf2   : > { %v405_v28 = vpop.f32.mrf.mxu0 }
  0xf3   : > { %v406_v30 = vadd.f32 %v405_v28, %v297_v21  ;;  %v414_v36 = vmax.f32 %v404_v27, 0.0 }
  0xf5   : > { %v415_v34 = vmax.f32 %v406_v30, 0.0 }
  0xf7   : > { %459 = vmatprep.subr.mxu1 %v415_v34 }
  0xf8   : > { %460 = vmatpush1.msra.mxu1 %v414_v36 }
  0xf9   : > { %461 = vmatprep.subr.mxu1 %v413_v38 }
  0xfa   : > { %462 = vmatpush1.msra.mxu1 %v412_v40 }
  0xfb   : > { %463 = vmatprep.subr.mxu1 %v411_v41 }
  0xfc   : > { %464 = vmatpush1.msra.mxu1 %v410_v44 }
  0xfd   : > { %465 = vmatprep.subr.mxu1 %v409_v45 }
  0xfe   : > { %466 = vmatpush1.msra.mxu1 %v408_v46 }
  0xff   : > { %624 = vmatmul.mubr.msk.f32.vlgmr.msra.gmra.mxu1 %vm431_vm3, %v422_v47 }
 0x1bf   : > { %v501_v53 = vpop.f32.mrf.mxu1 }
 0x1c0   : > { %v502_v56 = vadd.f32 %v501_v53, %v429_v54 }
 0x1c1   : > { %v503_v55 = vpop.f32.mrf.mxu1 }
 0x1c2   : > { %v504_v57 = vadd.f32 %v503_v55, %v429_v54 }
 0x1c4   : > { %v508_v59 = vcombine.low %v502_v56, %v504_v57 }
 0x1c6   : > { %v515_v60 = vrot.slane %v508_v59, %v514_v58 }
 0x1c8   : > { %v522_v61 = vrot.slane %v515_v60, %v514_v58 }
 0x1ca   : > { %528 = vst.msk [vmem:[%s267_s17] sm:$0x3] %vm526_vm4, %v522_v61 }
 0x1cb PF: > { %s22_s28 = sadd.s32 1, %s695_s28   ;;  %s833_s26 = smov %s691_s27 }
 0x1cc   : > { %p19_p11 = scmp.ge.s32.totalorder %s22_s28, 4   ;;  %s834_s27 = smov %s836_s0 }
 0x1ce   :  { %21 = sbr.rel (!%p19_p11) target bundleno = 17 (0x11), region = 70 }

</bundles_post_ra>
